<compile_context>
chip_gen: v7x
topology: tpu7x:2x2x1
jax: 0.10.0
libtpu: 0.0.40
codegen_flags: <defaults>
</compile_context>

<pallas_src>
import functools

import jax
import jax.numpy as jnp
import numpy as np
from jax.experimental import pallas as pl
from jax.experimental.pallas import tpu as pltpu


def _cdiv(a, b):
    return -(-a // b)


def _round_up(x, m):
    return _cdiv(x, m) * m


def _pad2d(a, rows, cols):
    r, c = a.shape
    if (r, c) == (rows, cols):
        return a
    return jnp.zeros((rows, cols), a.dtype).at[:r, :c].set(a)


# --------------------------------------------------------------- prep kernel
def _prep_kernel(x_ref, w_ref, b_ref, v0_ref, v1_ref, h_ref, f1_ref, f2_ref):
    """h = x @ W + b ;  f1 = sum(h*v0) ;  f2 = sum(h*v1)   (row-tiled, once)."""
    h = jnp.dot(x_ref[...], w_ref[...],
                preferred_element_type=jnp.float32) + b_ref[...]      # (TN, Cp)
    h_ref[...] = h
    # VPU/XLU reductions instead of an MXU matmul with only 2 output columns.
    f1_ref[...] = jnp.sum(h * v0_ref[...], axis=1, keepdims=True)     # (TN, 1)
    f2_ref[...] = jnp.sum(h * v1_ref[...], axis=1, keepdims=True)     # (TN, 1)


# ---------------------------------------------------------- attention kernel
def _attn_kernel(adj_ref, f1_ref, f2t_ref, h_ref, o_ref, denom_ref, m_ref, *,
                 inv_temp, n_cols, col_tile, apply_col_mask, use_running_max):
    k = pl.program_id(1)

    @pl.when(k == 0)
    def _():
        o_ref[...] = jnp.zeros_like(o_ref)
        denom_ref[...] = jnp.zeros_like(denom_ref)
        if use_running_max:
            m_ref[...] = jnp.full_like(m_ref, -1e30)

    adj = adj_ref[...].astype(jnp.float32)                     # (TM, TN)
    logits = adj * (f1_ref[...] + f2t_ref[...])                # (TM, TN)
    # to_sparse(): entries with an exactly-zero logit are dropped.
    mask = logits != 0.0
    if apply_col_mask:  # ragged last column tile of the native adjacency
        col_ids = (jax.lax.broadcasted_iota(jnp.int32, (1, col_tile), 1)
                   + k * col_tile)
        mask = jnp.logical_and(mask, col_ids < n_cols)
    # (sigmoid(x) - 0.5) / temp == (0.5/temp) * tanh(x/2): single EUP op.
    scaled = jnp.float32(0.5 * inv_temp) * jnp.tanh(0.5 * logits)

    if use_running_max:  # only needed for extreme temperatures (0.5/temp >= 80)
        masked = jnp.where(mask, scaled, jnp.float32(-1e30))
        m_prev = m_ref[...]
        m_new = jnp.maximum(m_prev, jnp.max(masked, axis=1, keepdims=True))
        alpha = jnp.exp(m_prev - m_new)
        e = jnp.where(mask, jnp.exp(scaled - m_new), 0.0)
        denom_ref[...] = alpha * denom_ref[...] + jnp.sum(e, axis=1,
                                                          keepdims=True)
        o_ref[...] = alpha * o_ref[...] + jnp.dot(
            e, h_ref[...], preferred_element_type=jnp.float32)
        m_ref[...] = m_new
    else:
        # |scaled| <= 0.5/temp << 80 so exp cannot overflow; softmax is
        # shift-invariant, so skipping the row-max reduction is exact.
        e = jnp.where(mask, jnp.exp(scaled), 0.0)
        denom_ref[...] += jnp.sum(e, axis=1, keepdims=True)
        # TODO(synk): on v7x an error-compensated bf16 split of this f32
        # matmul (probs_hi/lo @ h_bf16) is ~1.5-2x faster on the MXU; it needs
        # re-validation against the 1e-5 reference before enabling.
        o_ref[...] += jnp.dot(e, h_ref[...],
                              preferred_element_type=jnp.float32)

    @pl.when(k == pl.num_programs(1) - 1)
    def _():
        d = denom_ref[...]
        # Rows whose stored-entry set is empty densify back to zeros (torch).
        o_ref[...] = o_ref[...] * jnp.where(d > 0.0, 1.0 / d, 0.0)


# ----------------------------------------------------- tile / VMEM budgeting
def _attn_vmem_bytes(tm, tn, c_pad, adj_bytes):
    stream = 2 * tm * tn * adj_bytes        # adjacency tiles (double-buffered)
    stream += 2 * tn * c_pad * 4            # h tiles (double-buffered)
    stream += 2 * (tn * 4 + tm * 4)         # f2^T / f1 slices
    out = 2 * tm * c_pad * 4                # output accumulator block
    scratch = 2 * tm * 4                    # softmax denom + running max
    temps = 4 * tm * tn * 4                 # in-kernel f32 temporaries
    return stream + out + scratch + temps


def _choose_tiles(n, c_pad, adj_bytes, budget):
    """Largest (TM mult of 8, TN mult of 128) tiles fitting the VMEM budget."""
    if n < 128:
        tn_cap, tm_cap = 128, _round_up(max(n, 1), 8)
    else:
        tn_cap = min(512, (n // 128) * 128)
        tm_cap = min(1024, (n // 8) * 8)
    best, best_tm = (8, 128), -1
    tn = tn_cap
    while tn >= 128:
        fixed = 2 * tn * c_pad * 4 + 2 * tn * 4
        per_tm = 2 * tn * adj_bytes + 2 * c_pad * 4 + 4 * tn * 4 + 16
        tm = int(min(tm_cap, max((budget - fixed) // per_tm, 0) // 8 * 8))
        if tm >= min(128, tm_cap):
            return tm, tn
        if tm > best_tm:
            best_tm, best = tm, (max(tm, 8), tn)
        tn -= 128
    return best


# ------------------------------------------------------------------- wrapper
def gat_single_head(node_feats, adj_matrix, w, b, v0, v1, temp=1.0,
                    adj_stream_dtype=None):
    """node_feats: (N, c_in), adj_matrix: (N, N), w: (c_in, c_out),
    b: (1, c_out), v0/v1: (c_out, 1).  Returns (N, c_out) float32.

    adj_stream_dtype: optional dtype for streaming the adjacency (e.g.
    jnp.bfloat16 -- exact for 0/1 adjacencies, halves the dominant HBM stream
    on v5e/v6e); None keeps the native dtype (exact for arbitrary weights)."""
    n, c_in = node_feats.shape
    c_out = w.shape[1]
    f32 = jnp.float32

    c_pad = _round_up(c_out, 128)            # lane-dense feature dim

    adj_stream = adj_matrix
    if (adj_stream_dtype is not None
            and adj_matrix.dtype != jnp.dtype(adj_stream_dtype)):
        adj_stream = adj_matrix.astype(adj_stream_dtype)
    adj_bytes = jnp.dtype(adj_stream.dtype).itemsize

    # Per-core VMEM capacity (v5e/v6e: 128 MiB, v7x: 64 MiB); fall back to a
    # conservative 64 MiB if it cannot be queried.
    try:
        vmem_cap = int(pltpu.get_tpu_info().vmem_capacity_bytes)
    except Exception:  # pragma: no cover - hardware query best-effort
        vmem_cap = 64 << 20
    vmem_cap = max(vmem_cap, 32 << 20)
    budget = int(0.70 * vmem_cap)

    tm, tn = _choose_tiles(n, c_pad, adj_bytes, budget)

    # Prefer an even number of row blocks so both v7x TensorCores get work.
    grid_rows = _cdiv(n, tm)
    if grid_rows > 1 and grid_rows % 2 == 1:
        tm_even = _round_up(_cdiv(n, grid_rows + 1), 8)
        if 8 <= tm_even <= tm:
            tm = tm_even
            grid_rows = _cdiv(n, tm)
    grid_cols = _cdiv(n, tn)

    n_rows_cover = grid_rows * tm            # rows touched by the row grid
    n_h = _round_up(n_rows_cover, tn)        # rows of h / f1 / f2 (padded)

    # The adjacency is consumed in place; only tiny graphs (N < 128, where a
    # lane-dense (TM, TN) tile cannot fit inside the native array) get an
    # explicit zero-padded copy.  Zero padding keeps the dropped-entry mask.
    if n < 128:
        adj_stream = _pad2d(adj_stream, n_rows_cover, grid_cols * tn)

    est = _attn_vmem_bytes(tm, tn, c_pad, adj_bytes)
    vmem_limit = int(min(0.9 * vmem_cap, max(1.4 * est + (2 << 20), 32 << 20)))

    # Small zero-padded parameters / inputs (cheap; never the (N, N) matrix).
    x_p = _pad2d(node_feats.astype(f32), n_h, c_in)
    w_p = _pad2d(w.astype(f32), c_in, c_pad)
    b_p = _pad2d(b.astype(f32), 1, c_pad)
    v0r = _pad2d(v0.astype(f32).reshape(1, c_out), 1, c_pad)
    v1r = _pad2d(v1.astype(f32).reshape(1, c_out), 1, c_pad)

    # ---- pass 1: linear + attention projections (computed once) ----
    # TODO(synk): W is kept fully VMEM-resident; K-tile the prep matmul if
    # c_in * c_pad ever approaches the VMEM budget.
    h_pad, f1, f2 = pl.pallas_call(
        _prep_kernel,
        out_shape=(jax.ShapeDtypeStruct((n_h, c_pad), f32),
                   jax.ShapeDtypeStruct((n_h, 1), f32),
                   jax.ShapeDtypeStruct((n_h, 1), f32)),
        grid=(n_h // tn,),
        in_specs=[
            pl.BlockSpec((tn, c_in), lambda i: (i, 0)),       # x rows (stream)
            pl.BlockSpec((c_in, c_pad), lambda i: (0, 0)),    # W     (resident)
            pl.BlockSpec((1, c_pad), lambda i: (0, 0)),       # bias
            pl.BlockSpec((1, c_pad), lambda i: (0, 0)),       # v0^T
            pl.BlockSpec((1, c_pad), lambda i: (0, 0)),       # v1^T
        ],
        out_specs=(
            pl.BlockSpec((tn, c_pad), lambda i: (i, 0)),      # h
            pl.BlockSpec((tn, 1), lambda i: (i, 0)),          # f1
            pl.BlockSpec((tn, 1), lambda i: (i, 0)),          # f2
        ),
        compiler_params=pltpu.CompilerParams(
            dimension_semantics=("parallel",),
            vmem_limit_bytes=vmem_limit),
    )(x_p, w_p, b_p, v0r, v1r)

    f2t = f2.reshape(1, n_h)                 # lane-dense row; trivial reshape

    # ---- pass 2: streamed masked-softmax attention (online over columns) ----
    inv_temp = 1.0 / float(temp)
    kernel = functools.partial(
        _attn_kernel,
        inv_temp=inv_temp,
        n_cols=n,
        col_tile=tn,
        apply_col_mask=(n % tn != 0),
        use_running_max=(0.5 * inv_temp >= 80.0))
    out_pad = pl.pallas_call(
        kernel,
        out_shape=jax.ShapeDtypeStruct((n_rows_cover, c_pad), f32),
        grid=(grid_rows, grid_cols),
        in_specs=[
            pl.BlockSpec((tm, tn), lambda i, k: (i, k)),       # adj (stream)
            pl.BlockSpec((tm, 1), lambda i, k: (i, 0)),        # f1 rows
            pl.BlockSpec((1, tn), lambda i, k: (0, k)),        # f2^T slice
            pl.BlockSpec((tn, c_pad), lambda i, k: (k, 0)),    # h rows (stream)
        ],
        out_specs=pl.BlockSpec((tm, c_pad), lambda i, k: (i, 0)),
        scratch_shapes=[pltpu.VMEM((tm, 1), f32),              # softmax denom
                        pltpu.VMEM((tm, 1), f32)],             # running max
        compiler_params=pltpu.CompilerParams(
            dimension_semantics=("parallel", "arbitrary"),
            vmem_limit_bytes=vmem_limit),
    )(adj_stream, f1, f2t, h_pad)

    return out_pad[:n, :c_out]


# ---------------------------------------------------------------- reference
def _reference(node_feats, adj, w, b, v0, v1, temp=1.0):
    """Pure-JAX reference with the same semantics (for the self-check)."""
    h = node_feats @ w + b
    f1 = h @ v0
    f2 = h @ v1
    logits = adj * (f1 + f2.T)
    u = jax.nn.sigmoid(logits) - 0.5
    mask = logits != 0.0
    masked = jnp.where(mask, u / temp, -jnp.inf)
    m = jnp.max(jnp.where(mask, masked, -1e30), axis=1, keepdims=True)
    e = jnp.where(mask, jnp.exp(masked - m), 0.0)
    denom = jnp.sum(e, axis=1, keepdims=True)
    probs = jnp.where(denom > 0.0, e / denom, 0.0)
    return probs @ h


if __name__ == "__main__":
    key = jax.random.PRNGKey(0)
    k_x, k_adj, k_w, k_v0, k_v1 = jax.random.split(key, 5)

    N, C_IN, C_OUT = 16, 8, 32
    TEMP = 1.0

    # Deterministic parameter init matching the module's __init__ shapes/ranges.
    lim_w = float(np.sqrt(6.0 / (C_IN + C_OUT)))
    lim_v = float(np.sqrt(6.0 / (C_OUT + 1)))
    w = jax.random.uniform(k_w, (C_IN, C_OUT), jnp.float32, -lim_w, lim_w)
    b = jnp.zeros((1, C_OUT), jnp.float32)
    v0 = jax.random.uniform(k_v0, (C_OUT, 1), jnp.float32, -lim_v, lim_v)
    v1 = jax.random.uniform(k_v1, (C_OUT, 1), jnp.float32, -lim_v, lim_v)

    # Inputs: node features + sparse-ish symmetric 0/1 adjacency w/ self-loops.
    node_feats = jax.random.uniform(k_x, (N, C_IN), jnp.float32, -1.0, 1.0)
    rand_adj = jax.random.uniform(k_adj, (N, N), jnp.float32)
    adj = (rand_adj < 0.3).astype(jnp.float32)
    adj = jnp.maximum(adj, adj.T)
    adj = jnp.maximum(adj, jnp.eye(N, dtype=jnp.float32))

    ref = _reference(node_feats, adj, w, b, v0, v1, temp=TEMP)

    # Exact (native f32) adjacency streaming path.
    out = gat_single_head(node_feats, adj, w, b, v0, v1, temp=TEMP)
    out = jax.block_until_ready(out)
    np.testing.assert_allclose(np.asarray(out), np.asarray(ref),
                               rtol=1e-5, atol=1e-5)

    # bf16 adjacency streaming path (exact for 0/1 adjacency; v5e/v6e win).
    out_bf16 = gat_single_head(node_feats, adj, w, b, v0, v1, temp=TEMP,
                               adj_stream_dtype=jnp.bfloat16)
    out_bf16 = jax.block_until_ready(out_bf16)
    np.testing.assert_allclose(np.asarray(out_bf16), np.asarray(ref),
                               rtol=1e-5, atol=1e-5)

    print("KERNEL_OK")
</pallas_src>

<mosaic_0001>
module attributes {stable_mosaic.version = 11 : i64} {
  func.func @_prep_kernel(%arg0: i32, %arg1: memref<128x8xf32, #tpu.memory_space<vmem>>, %arg2: memref<8x128xf32, #tpu.memory_space<vmem>>, %arg3: memref<1x128xf32, #tpu.memory_space<vmem>>, %arg4: memref<1x128xf32, #tpu.memory_space<vmem>>, %arg5: memref<1x128xf32, #tpu.memory_space<vmem>>, %arg6: memref<128x128xf32, #tpu.memory_space<vmem>>, %arg7: memref<128x1xf32, #tpu.memory_space<vmem>>, %arg8: memref<128x1xf32, #tpu.memory_space<vmem>>) attributes {dimension_semantics = [#tpu.dimension_semantics<parallel>], iteration_bounds = array<i64: 1>, scalar_prefetch = 0 : i64, scratch_operands = 0 : i64, tpu.core_type = #tpu.core_type<tc>, window_params = [{transform_indices = @transform_0, window_bounds = array<i64: 128, 8>}, {pipeline_mode = #tpu.pipeline_mode<synchronous>, transform_indices = @transform_1, window_bounds = array<i64: 8, 128>}, {pipeline_mode = #tpu.pipeline_mode<synchronous>, transform_indices = @transform_2, window_bounds = array<i64: 1, 128>}, {pipeline_mode = #tpu.pipeline_mode<synchronous>, transform_indices = @transform_3, window_bounds = array<i64: 1, 128>}, {pipeline_mode = #tpu.pipeline_mode<synchronous>, transform_indices = @transform_4, window_bounds = array<i64: 1, 128>}, {transform_indices = @transform_5, window_bounds = array<i64: 128, 128>}, {transform_indices = @transform_6, window_bounds = array<i64: 128, 1>}, {transform_indices = @transform_7, window_bounds = array<i64: 128, 1>}]} {
    %c0 = arith.constant 0 : index
    %c0_0 = arith.constant 0 : index
    %0 = vector.load %arg1[%c0, %c0_0] : memref<128x8xf32, #tpu.memory_space<vmem>>, vector<128x8xf32>
    %c0_1 = arith.constant 0 : index
    %c0_2 = arith.constant 0 : index
    %1 = vector.load %arg2[%c0_1, %c0_2] : memref<8x128xf32, #tpu.memory_space<vmem>>, vector<8x128xf32>
    %cst = arith.constant dense<0.000000e+00> : vector<128x128xf32>
    %2 = tpu.matmul %0, %1, %cst {dimension_numbers = #tpu.dot_dimension_numbers<[1], [0], [0], [1], [0, 0, 1, 1], [], []>} : vector<128x8xf32>, vector<8x128xf32>, vector<128x128xf32> -> vector<128x128xf32>
    %c0_3 = arith.constant 0 : index
    %c0_4 = arith.constant 0 : index
    %3 = vector.load %arg3[%c0_3, %c0_4] : memref<1x128xf32, #tpu.memory_space<vmem>>, vector<1x128xf32>
    %4 = vector.broadcast %3 : vector<1x128xf32> to vector<128x128xf32>
    %5 = arith.addf %2, %4 : vector<128x128xf32>
    %c0_5 = arith.constant 0 : index
    %c0_6 = arith.constant 0 : index
    %6 = vector.load %arg6[%c0_5, %c0_6] : memref<128x128xf32, #tpu.memory_space<vmem>>, vector<128x128xf32>
    tpu.vector_store %arg6[%c0_5, %c0_6], %5 {strides = array<i32>} : memref<128x128xf32, #tpu.memory_space<vmem>>, vector<128x128xf32>,
    %c0_7 = arith.constant 0 : index
    %c0_8 = arith.constant 0 : index
    %7 = vector.load %arg4[%c0_7, %c0_8] : memref<1x128xf32, #tpu.memory_space<vmem>>, vector<1x128xf32>
    %8 = vector.broadcast %7 : vector<1x128xf32> to vector<128x128xf32>
    %9 = arith.mulf %5, %8 : vector<128x128xf32>
    %cst_9 = arith.constant dense<0.000000e+00> : vector<128xf32>
    %10 = vector.multi_reduction <add>, %9, %cst_9 [1] : vector<128x128xf32> to vector<128xf32>
    %11 = vector.shape_cast %10 : vector<128xf32> to vector<128x1xf32>
    %c0_10 = arith.constant 0 : index
    %c0_11 = arith.constant 0 : index
    %12 = vector.load %arg7[%c0_10, %c0_11] : memref<128x1xf32, #tpu.memory_space<vmem>>, vector<128x1xf32>
    tpu.vector_store %arg7[%c0_10, %c0_11], %11 {strides = array<i32>} : memref<128x1xf32, #tpu.memory_space<vmem>>, vector<128x1xf32>,
    %c0_12 = arith.constant 0 : index
    %c0_13 = arith.constant 0 : index
    %13 = vector.load %arg5[%c0_12, %c0_13] : memref<1x128xf32, #tpu.memory_space<vmem>>, vector<1x128xf32>
    %14 = vector.broadcast %13 : vector<1x128xf32> to vector<128x128xf32>
    %15 = arith.mulf %5, %14 : vector<128x128xf32>
    %cst_14 = arith.constant dense<0.000000e+00> : vector<128xf32>
    %16 = vector.multi_reduction <add>, %15, %cst_14 [1] : vector<128x128xf32> to vector<128xf32>
    %17 = vector.shape_cast %16 : vector<128xf32> to vector<128x1xf32>
    %c0_15 = arith.constant 0 : index
    %c0_16 = arith.constant 0 : index
    %18 = vector.load %arg8[%c0_15, %c0_16] : memref<128x1xf32, #tpu.memory_space<vmem>>, vector<128x1xf32>
    tpu.vector_store %arg8[%c0_15, %c0_16], %17 {strides = array<i32>} : memref<128x1xf32, #tpu.memory_space<vmem>>, vector<128x1xf32>,
    return
  }
  func.func @transform_0(%arg0: i32) -> (i32, i32) {
    %c0_i32 = arith.constant 0 : i32
    %c0_i32_0 = arith.constant 0 : i32
    return %arg0, %c0_i32 : i32, i32
  }
  func.func @transform_1(%arg0: i32) -> (i32, i32) {
    %c0_i32 = arith.constant 0 : i32
    %c0_i32_0 = arith.constant 0 : i32
    %c0_i32_1 = arith.constant 0 : i32
    return %c0_i32, %c0_i32_0 : i32, i32
  }
  func.func @transform_2(%arg0: i32) -> (i32, i32) {
    %c0_i32 = arith.constant 0 : i32
    %c0_i32_0 = arith.constant 0 : i32
    %c0_i32_1 = arith.constant 0 : i32
    return %c0_i32, %c0_i32_0 : i32, i32
  }
  func.func @transform_3(%arg0: i32) -> (i32, i32) {
    %c0_i32 = arith.constant 0 : i32
    %c0_i32_0 = arith.constant 0 : i32
    %c0_i32_1 = arith.constant 0 : i32
    return %c0_i32, %c0_i32_0 : i32, i32
  }
  func.func @transform_4(%arg0: i32) -> (i32, i32) {
    %c0_i32 = arith.constant 0 : i32
    %c0_i32_0 = arith.constant 0 : i32
    %c0_i32_1 = arith.constant 0 : i32
    return %c0_i32, %c0_i32_0 : i32, i32
  }
  func.func @transform_5(%arg0: i32) -> (i32, i32) {
    %c0_i32 = arith.constant 0 : i32
    %c0_i32_0 = arith.constant 0 : i32
    return %arg0, %c0_i32 : i32, i32
  }
  func.func @transform_6(%arg0: i32) -> (i32, i32) {
    %c0_i32 = arith.constant 0 : i32
    %c0_i32_0 = arith.constant 0 : i32
    return %arg0, %c0_i32 : i32, i32
  }
  func.func @transform_7(%arg0: i32) -> (i32, i32) {
    %c0_i32 = arith.constant 0 : i32
    %c0_i32_0 = arith.constant 0 : i32
    return %arg0, %c0_i32 : i32, i32
  }
}

</mosaic_0001>

<bundles_post_ra>
// kernel: tpu_custom_call.1
= control target key start
LH: loop header
LB: loop body
LE: loop exit
PB: predicated region body
PF: predicated region fallthrough
CT: control target
= control target key end

     0   :  { %vm48_vm0 = vcmask 64512   ;;  %s811_s0 = inlined_call_operand.vmem [shape: f32[128,8], index: 0, kind: input, shape index: {}]   ;;  %s812_s1 = inlined_call_operand.vmem [shape: f32[8,128], index: 1, kind: input, shape index: {}]   ;;  %s813_s2 = inlined_call_operand.vmem [shape: f32[1,128], index: 2, kind: input, shape index: {}]   ;;  %s814_s3 = inlined_call_operand.vmem [shape: f32[1,128], index: 3, kind: input, shape index: {}]   ;;  %s815_s4 = inlined_call_operand.vmem [shape: f32[1,128], index: 4, kind: input, shape index: {}]   ;;  %s816_s5 = inlined_call_operand.hbm [shape: f32[128,128], index: 5, kind: output, shape index: {0}]   ;;  %s817_s6 = inlined_call_operand.vmem [shape: f32[128,1], index: 6, kind: output, shape index: {1}]   ;;  %s818_s7 = inlined_call_operand.vmem [shape: f32[128,1], index: 7, kind: output, shape index: {2}]  }
   0x1   :  { %v40_v0 = vld [vmem:[%s812_s1] sm:$0xff]  ;;  %v25_v3 = vld [vmem:[%s811_s0 + $0x8] sm:$0xff]  ;;  %v26_v5 = vld [vmem:[%s811_s0 + $0x10] sm:$0xff] }
   0x2   :  { %v24_v1 = vld [vmem:[%s811_s0] sm:$0xff]  ;;  %461 = vmatprep.subr.mxu0 %v40_v0  ;;  %487 = vmatprep.subr.mxu1 %v40_v0  ;;  %v33_v4 = vld [vmem:[%s811_s0 + $0x48] sm:$0xff]  ;;  %v34_v6 = vld [vmem:[%s811_s0 + $0x50] sm:$0xff] }
   0x3   :  { %v32_v2 = vld [vmem:[%s811_s0 + $0x40] sm:$0xff]  ;;  %462 = vmatpush3.msra.mxu0 %v40_v0  ;;  %488 = vmatpush3.msra.mxu1 %v40_v0  ;;  %v27_v7 = vld [vmem:[%s811_s0 + $0x18] sm:$0xff] }
   0x4   :  { %463 = vmatprep.mubr.msk.f32.mxu0 %vm48_vm0, %v24_v1  ;;  %475 = vmatprep.mubr.msk.f32.mxu1 %vm48_vm0, %v32_v2  ;;  %v35_v8 = vld [vmem:[%s811_s0 + $0x58] sm:$0xff] }
   0x5   :  { %464 = vmatmul.mubr.msk.f32.vlgmr.msra.gmra.mrb[0].mxu0 %vm48_vm0, %v25_v3  ;;  %476 = vmatmul.mubr.msk.f32.vlgmr.msra.gmra.mrb[0].mxu1 %vm48_vm0, %v33_v4 }
   0x6   :  { %466 = vmatprep.mubr.msk.f32.mxu0 %vm48_vm0, %v26_v5  ;;  %478 = vmatprep.mubr.msk.f32.mxu1 %vm48_vm0, %v34_v6 }
   0x7   :  { %13 = vsyncpa [#allocation3], 0  ;;  %v28_v9 = vld [vmem:[%s811_s0 + $0x20] sm:$0xff]  ;;  %v29_v11 = vld [vmem:[%s811_s0 + $0x28] sm:$0xff] }
   0x8   :  { %v36_v10 = vld [vmem:[%s811_s0 + $0x60] sm:$0xff]  ;;  %v37_v12 = vld [vmem:[%s811_s0 + $0x68] sm:$0xff]  ;;  %v30_v13 = vld [vmem:[%s811_s0 + $0x30] sm:$0xff] }
   0x9   :  { %467 = vmatmul.mubr.msk.f32.gmra.mrb[2].mxu0 %vm48_vm0, %v27_v7  ;;  %479 = vmatmul.mubr.msk.f32.gmra.mrb[2].mxu1 %vm48_vm0, %v35_v8  ;;  %v38_v14 = vld [vmem:[%s811_s0 + $0x70] sm:$0xff]  ;;  %v31_v15 = vld [vmem:[%s811_s0 + $0x38] sm:$0xff]  ;;  %v425_v17 = vld [vmem:[%s813_s2] ss:$0 sm:$0xff] }
   0xa   :  { %469 = vmatprep.mubr.msk.f32.mxu0 %vm48_vm0, %v28_v9  ;;  %481 = vmatprep.mubr.msk.f32.mxu1 %vm48_vm0, %v36_v10  ;;  %v39_v16 = vld [vmem:[%s811_s0 + $0x78] sm:$0xff]  ;;  %v632_v20 = vld [vmem:[%s814_s3] ss:$0 sm:$0xff]  ;;  %s516_s3 = smov [#allocation2]  }
   0xb   :  { %v639_v29 = vld [vmem:[%s815_s4] ss:$0 sm:$0xff]  ;;  %s406_s4 = sshll.u32 %s516_s3, 4  ;;  %s407_s4 = int_to_ptr.vmem [resolvable:$true] %s406_s4 }
   0xc   :  { %s492_s14 = scalar_lea.vmem %s407_s4, 2048  ;;  %p497_p1 = scmp.lt.s32.totalorder %s407_s4, %s407_s4 }
   0xd   :  { %470 = vmatmul.mubr.msk.f32.gmra.mrb[4].mxu0 %vm48_vm0, %v29_v11  ;;  %482 = vmatmul.mubr.msk.f32.gmra.mrb[4].mxu1 %vm48_vm0, %v37_v12  ;;  %p493_p0 = scmp.ne.s32.totalorder %s407_s4, %s492_s14  ;;  %p498_p2 = scmp.lt.s32.totalorder %s492_s14, %s492_s14 }
   0xe   :  { %472 = vmatprep.mubr.msk.f32.mxu0 %vm48_vm0, %v30_v13  ;;  %484 = vmatprep.mubr.msk.f32.mxu1 %vm48_vm0, %v38_v14 }
   0xf   :  { %p499_p3 = por %p498_p2, %p497_p1 }
  0x11   :  { %473 = vmatmul.mubr.msk.f32.gmra.mrb[6].mxu0 %vm48_vm0, %v31_v15  ;;  %485 = vmatmul.mubr.msk.f32.gmra.mrb[6].mxu1 %vm48_vm0, %v39_v16  ;;  %p500_p4 = pnand %p499_p3, %p493_p0 }
  0xd8   :  { %v465_v18 = vpop.f32.mrb[0].mxu0  ;;  %v477_v19 = vpop.f32.mrb[0].mxu1 }
  0xd9   :  { %v169_v21 = vadd.f32 %v465_v18, %v425_v17  ;;  %v209_v22 = vadd.f32 %v477_v19, %v425_v17  ;;  %v163_v23 = vpop.f32.mrb[1].mxu0  ;;  %v203_v24 = vpop.f32.mrb[1].mxu1 }
  0xda   :  { %v164_v25 = vadd.f32 %v425_v17, %v163_v23  ;;  %v204_v26 = vadd.f32 %v425_v17, %v203_v24 }
  0xdb   :  { %243 = vst [vmem:[#allocation2 + $0x8] sm:$0xff] %v169_v21  ;;  %251 = vst [vmem:[#allocation2 + $0x48] sm:$0xff] %v209_v22  ;;  %v274_v27 = vmul.f32 %v632_v20, %v209_v22  ;;  %v266_v28 = vmul.f32 %v632_v20, %v169_v21  ;;  %v338_v38 = vmul.f32 %v639_v29, %v169_v21 }
  0xdc   :  { %242 = vst [vmem:[#allocation2] sm:$0xff] %v164_v25  ;;  %250 = vst [vmem:[#allocation2 + $0x40] sm:$0xff] %v204_v26  ;;  %v468_v30 = vpop.f32.mrb[2].mxu0  ;;  %v480_v31 = vpop.f32.mrb[2].mxu1  ;;  %v265_v39 = vmul.f32 %v632_v20, %v164_v25  ;;  %v346_v48 = vmul.f32 %v639_v29, %v209_v22  ;;  %v273_v49 = vmul.f32 %v632_v20, %v204_v26 }
  0xdd   :  { %299 = vadd.xlane.f32.xlu1 %v274_v27  ;;  %283 = vadd.xlane.f32.xlu0 %v266_v28  ;;  %v179_v32 = vadd.f32 %v468_v30, %v425_v17  ;;  %v173_v33 = vpop.f32.mrb[3].mxu0  ;;  %v219_v34 = vadd.f32 %v480_v31, %v425_v17  ;;  %v213_v35 = vpop.f32.mrb[3].mxu1  ;;  %v337_v59 = vmul.f32 %v639_v29, %v164_v25 }
  0xde   :  { %v174_v36 = vadd.f32 %v425_v17, %v173_v33  ;;  %v214_v37 = vadd.f32 %v425_v17, %v213_v35  ;;  %v345_v61 = vmul.f32 %v639_v29, %v204_v26 }
  0xdf   :  { %245 = vst [vmem:[#allocation2 + $0x18] sm:$0xff] %v179_v32  ;;  %253 = vst [vmem:[#allocation2 + $0x58] sm:$0xff] %v219_v34  ;;  %v268_v52 = vmul.f32 %v632_v20, %v179_v32  ;;  %v276_v60 = vmul.f32 %v632_v20, %v219_v34  ;;  %v340_v62 = vmul.f32 %v639_v29, %v179_v32 }
  0xe0   :  { %244 = vst [vmem:[#allocation2 + $0x10] sm:$0xff] %v174_v36  ;;  %252 = vst [vmem:[#allocation2 + $0x50] sm:$0xff] %v214_v37  ;;  %v471_v40 = vpop.f32.mrb[4].mxu0  ;;  %v483_v41 = vpop.f32.mrb[4].mxu1  ;;  %v275_v63 = vmul.f32 %v632_v20, %v214_v37  ;;  %v348_v0 = vmul.f32 %v639_v29, %v219_v34  ;;  %v339_v1 = vmul.f32 %v639_v29, %v174_v36 }
  0xe1   :  { %355 = vadd.xlane.f32.xlu1 %v338_v38  ;;  %281 = vadd.xlane.f32.xlu0 %v265_v39  ;;  %v189_v42 = vadd.f32 %v471_v40, %v425_v17  ;;  %v183_v43 = vpop.f32.mrb[5].mxu0  ;;  %v229_v44 = vadd.f32 %v483_v41, %v425_v17  ;;  %v223_v45 = vpop.f32.mrb[5].mxu1  ;;  %v267_v2 = vmul.f32 %v632_v20, %v174_v36 }
  0xe2   :  { %v184_v46 = vadd.f32 %v425_v17, %v183_v43  ;;  %v224_v47 = vadd.f32 %v425_v17, %v223_v45  ;;  %v347_v3 = vmul.f32 %v639_v29, %v214_v37 }
  0xe3   :  { %247 = vst [vmem:[#allocation2 + $0x28] sm:$0xff] %v189_v42  ;;  %255 = vst [vmem:[#allocation2 + $0x68] sm:$0xff] %v229_v44  ;;  %v270_v4 = vmul.f32 %v632_v20, %v189_v42  ;;  %v278_v6 = vmul.f32 %v632_v20, %v229_v44  ;;  %v342_v8 = vmul.f32 %v639_v29, %v189_v42 }
  0xe4   :  { %246 = vst [vmem:[#allocation2 + $0x20] sm:$0xff] %v184_v46  ;;  %254 = vst [vmem:[#allocation2 + $0x60] sm:$0xff] %v224_v47  ;;  %v474_v50 = vpop.f32.mrb[6].mxu0  ;;  %v486_v51 = vpop.f32.mrb[6].mxu1  ;;  %v269_v5 = vmul.f32 %v632_v20, %v184_v46  ;;  %v277_v7 = vmul.f32 %v632_v20, %v224_v47  ;;  %v341_v9 = vmul.f32 %v639_v29, %v184_v46 }
  0xe5   :  { %371 = vadd.xlane.f32.xlu1 %v346_v48  ;;  %297 = vadd.xlane.f32.xlu0 %v273_v49  ;;  %v199_v53 = vadd.f32 %v474_v50, %v425_v17  ;;  %v193_v54 = vpop.f32.mrb[7].mxu0  ;;  %v239_v55 = vadd.f32 %v486_v51, %v425_v17  ;;  %v233_v56 = vpop.f32.mrb[7].mxu1  ;;  %v350_v10 = vmul.f32 %v639_v29, %v229_v44 }
  0xe6   :  { %v194_v57 = vadd.f32 %v425_v17, %v193_v54  ;;  %v234_v58 = vadd.f32 %v425_v17, %v233_v56  ;;  %v349_v11 = vmul.f32 %v639_v29, %v224_v47 }
  0xe7   :  { %249 = vst [vmem:[#allocation2 + $0x38] sm:$0xff] %v199_v53  ;;  %257 = vst [vmem:[#allocation2 + $0x78] sm:$0xff] %v239_v55  ;;  %v272_v12 = vmul.f32 %v632_v20, %v199_v53  ;;  %v280_v14 = vmul.f32 %v632_v20, %v239_v55  ;;  %v344_v16 = vmul.f32 %v639_v29, %v199_v53 }
  0xe8   :  { %248 = vst [vmem:[#allocation2 + $0x30] sm:$0xff] %v194_v57  ;;  %256 = vst [vmem:[#allocation2 + $0x70] sm:$0xff] %v234_v58  ;;  %v271_v13 = vmul.f32 %v632_v20, %v194_v57  ;;  %v279_v15 = vmul.f32 %v632_v20, %v234_v58  ;;  %v343_v17 = vmul.f32 %v639_v29, %v194_v57 }
  0xe9   :  { %287 = vadd.xlane.f32.xlu1 %v268_v52  ;;  %353 = vadd.xlane.f32.xlu0 %v337_v59  ;;  %v352_v18 = vmul.f32 %v639_v29, %v239_v55  ;;  %v351_v19 = vmul.f32 %v639_v29, %v234_v58 }
  0xed   :  { %303 = vadd.xlane.f32.xlu1 %v276_v60  ;;  %369 = vadd.xlane.f32.xlu0 %v345_v61 }
  0xf1   :  { %359 = vadd.xlane.f32.xlu1 %v340_v62  ;;  %301 = vadd.xlane.f32.xlu0 %v275_v63 }
  0xf5   :  { %375 = vadd.xlane.f32.xlu1 %v348_v0  ;;  %357 = vadd.xlane.f32.xlu0 %v339_v1 }
  0xf9   :  { %285 = vadd.xlane.f32.xlu1 %v267_v2  ;;  %373 = vadd.xlane.f32.xlu0 %v347_v3 }
  0xfd   :  { %291 = vadd.xlane.f32.xlu1 %v270_v4  ;;  %289 = vadd.xlane.f32.xlu0 %v269_v5 }
 0x101   :  { %307 = vadd.xlane.f32.xlu1 %v278_v6  ;;  %305 = vadd.xlane.f32.xlu0 %v277_v7 }
 0x105   :  { %363 = vadd.xlane.f32.xlu1 %v342_v8  ;;  %361 = vadd.xlane.f32.xlu0 %v341_v9 }
 0x109   :  { %379 = vadd.xlane.f32.xlu1 %v350_v10  ;;  %377 = vadd.xlane.f32.xlu0 %v349_v11 }
 0x10d   :  { %295 = vadd.xlane.f32.xlu1 %v272_v12  ;;  %293 = vadd.xlane.f32.xlu0 %v271_v13 }
 0x111   :  { %311 = vadd.xlane.f32.xlu1 %v280_v14  ;;  %309 = vadd.xlane.f32.xlu0 %v279_v15 }
 0x115   :  { %367 = vadd.xlane.f32.xlu1 %v344_v16  ;;  %365 = vadd.xlane.f32.xlu0 %v343_v17 }
 0x119   :  { %383 = vadd.xlane.f32.xlu1 %v352_v18  ;;  %381 = vadd.xlane.f32.xlu0 %v351_v19 }
 0x11a   :  { %503 = shalt.err (!%p500_p4)
}
 0x11b   :  { %s504_s17 = scalar_lea.hbm %s816_s5, 2048 }
 0x11c   :  { %p505_p5 = scmp.ne.s32.totalorder %s816_s5, %s504_s17  ;;  %p508_p6 = scmp.lt.u32.totalorder %s504_s17, %s816_s5 }
 0x11e   :  { %p510_p7 = pnand %p508_p6, %p505_p5 }
 0x120   :  { %513 = shalt.err (!%p510_p7)
}
 0x121   :  { %s517_s22 = smov 128   ;;  %s518_s23 = smov 8   ;;  %vm313_vm1 = vcmask 7168  }
 0x122   :  { %412 = dma.vmem_to_hbm [thread:$0]  %s407_s4, 2048, %s816_s5, [#allocation3], %s517_s22, %s517_s22, %s518_s23  }
 0x16a   :  { %v300_v20 = vpop.xlane.xlu1 %299  ;;  %v284_v21 = vpop.xlane.xlu0 %283 }
 0x16b   :  { %323 = vst.msk [vmem:[%s817_s6 + $0x48] sm:$0xff] %vm313_vm1, %v300_v20  ;;  %315 = vst.msk [vmem:[%s817_s6 + $0x8] sm:$0xff] %vm313_vm1, %v284_v21 }
 0x16e   :  { %v356_v22 = vpop.xlane.xlu1 %355  ;;  %v282_v23 = vpop.xlane.xlu0 %281 }
 0x16f   :  { %386 = vst.msk [vmem:[%s818_s7 + $0x8] sm:$0xff] %vm313_vm1, %v356_v22  ;;  %314 = vst.msk [vmem:[%s817_s6] sm:$0xff] %vm313_vm1, %v282_v23 }
 0x172   :  { %v372_v24 = vpop.xlane.xlu1 %371  ;;  %v298_v25 = vpop.xlane.xlu0 %297 }
 0x173   :  { %394 = vst.msk [vmem:[%s818_s7 + $0x48] sm:$0xff] %vm313_vm1, %v372_v24  ;;  %322 = vst.msk [vmem:[%s817_s6 + $0x40] sm:$0xff] %vm313_vm1, %v298_v25 }
 0x176   :  { %v288_v26 = vpop.xlane.xlu1 %287  ;;  %v354_v27 = vpop.xlane.xlu0 %353 }
 0x177   :  { %317 = vst.msk [vmem:[%s817_s6 + $0x18] sm:$0xff] %vm313_vm1, %v288_v26  ;;  %385 = vst.msk [vmem:[%s818_s7] sm:$0xff] %vm313_vm1, %v354_v27 }
 0x17a   :  { %v304_v28 = vpop.xlane.xlu1 %303  ;;  %v370_v29 = vpop.xlane.xlu0 %369 }
 0x17b   :  { %325 = vst.msk [vmem:[%s817_s6 + $0x58] sm:$0xff] %vm313_vm1, %v304_v28  ;;  %393 = vst.msk [vmem:[%s818_s7 + $0x40] sm:$0xff] %vm313_vm1, %v370_v29 }
 0x17e   :  { %v360_v30 = vpop.xlane.xlu1 %359  ;;  %v302_v31 = vpop.xlane.xlu0 %301 }
 0x17f   :  { %388 = vst.msk [vmem:[%s818_s7 + $0x18] sm:$0xff] %vm313_vm1, %v360_v30  ;;  %324 = vst.msk [vmem:[%s817_s6 + $0x50] sm:$0xff] %vm313_vm1, %v302_v31 }
 0x182   :  { %v376_v32 = vpop.xlane.xlu1 %375  ;;  %v358_v33 = vpop.xlane.xlu0 %357 }
 0x183   :  { %396 = vst.msk [vmem:[%s818_s7 + $0x58] sm:$0xff] %vm313_vm1, %v376_v32  ;;  %387 = vst.msk [vmem:[%s818_s7 + $0x10] sm:$0xff] %vm313_vm1, %v358_v33 }
 0x186   :  { %v286_v34 = vpop.xlane.xlu1 %285  ;;  %v374_v35 = vpop.xlane.xlu0 %373 }
 0x187   :  { %316 = vst.msk [vmem:[%s817_s6 + $0x10] sm:$0xff] %vm313_vm1, %v286_v34  ;;  %395 = vst.msk [vmem:[%s818_s7 + $0x50] sm:$0xff] %vm313_vm1, %v374_v35 }
 0x18a   :  { %v292_v36 = vpop.xlane.xlu1 %291  ;;  %v290_v37 = vpop.xlane.xlu0 %289 }
 0x18b   :  { %319 = vst.msk [vmem:[%s817_s6 + $0x28] sm:$0xff] %vm313_vm1, %v292_v36  ;;  %318 = vst.msk [vmem:[%s817_s6 + $0x20] sm:$0xff] %vm313_vm1, %v290_v37 }
 0x18e   :  { %v308_v38 = vpop.xlane.xlu1 %307  ;;  %v306_v39 = vpop.xlane.xlu0 %305 }
 0x18f   :  { %327 = vst.msk [vmem:[%s817_s6 + $0x68] sm:$0xff] %vm313_vm1, %v308_v38  ;;  %326 = vst.msk [vmem:[%s817_s6 + $0x60] sm:$0xff] %vm313_vm1, %v306_v39 }
 0x192   :  { %v364_v40 = vpop.xlane.xlu1 %363  ;;  %v362_v41 = vpop.xlane.xlu0 %361 }
 0x193   :  { %390 = vst.msk [vmem:[%s818_s7 + $0x28] sm:$0xff] %vm313_vm1, %v364_v40  ;;  %389 = vst.msk [vmem:[%s818_s7 + $0x20] sm:$0xff] %vm313_vm1, %v362_v41 }
 0x196   :  { %v380_v42 = vpop.xlane.xlu1 %379  ;;  %v378_v43 = vpop.xlane.xlu0 %377 }
 0x197   :  { %398 = vst.msk [vmem:[%s818_s7 + $0x68] sm:$0xff] %vm313_vm1, %v380_v42  ;;  %397 = vst.msk [vmem:[%s818_s7 + $0x60] sm:$0xff] %vm313_vm1, %v378_v43 }
 0x19a   :  { %v296_v44 = vpop.xlane.xlu1 %295  ;;  %v294_v45 = vpop.xlane.xlu0 %293 }
 0x19b   :  { %321 = vst.msk [vmem:[%s817_s6 + $0x38] sm:$0xff] %vm313_vm1, %v296_v44  ;;  %320 = vst.msk [vmem:[%s817_s6 + $0x30] sm:$0xff] %vm313_vm1, %v294_v45 }
 0x19e   :  { %v312_v46 = vpop.xlane.xlu1 %311  ;;  %v310_v47 = vpop.xlane.xlu0 %309 }
 0x19f   :  { %329 = vst.msk [vmem:[%s817_s6 + $0x78] sm:$0xff] %vm313_vm1, %v312_v46  ;;  %328 = vst.msk [vmem:[%s817_s6 + $0x70] sm:$0xff] %vm313_vm1, %v310_v47 }
 0x1a2   :  { %v368_v48 = vpop.xlane.xlu1 %367  ;;  %v366_v49 = vpop.xlane.xlu0 %365 }
 0x1a3   :  { %392 = vst.msk [vmem:[%s818_s7 + $0x38] sm:$0xff] %vm313_vm1, %v368_v48  ;;  %391 = vst.msk [vmem:[%s818_s7 + $0x30] sm:$0xff] %vm313_vm1, %v366_v49 }
 0x1a6   :  { %v384_v50 = vpop.xlane.xlu1 %383  ;;  %v382_v51 = vpop.xlane.xlu0 %381 }
 0x1a7   :  { %400 = vst.msk [vmem:[%s818_s7 + $0x78] sm:$0xff] %vm313_vm1, %v384_v50  ;;  %399 = vst.msk [vmem:[%s818_s7 + $0x70] sm:$0xff] %vm313_vm1, %v382_v51 }
 0x1a8   :  { %514 = dma.done.wait [#allocation3], 2048  }
 0x1a9   :  { %515 = vsyncadd [#allocation3], 4294965248 }
 0x1aa   :  { %424 = vsyncpa [#allocation3], 1 }

</bundles_post_ra>
